<compile_context>
chip_gen: v7x
topology: tpu7x:2x2x1
jax: 0.10.0
libtpu: 0.0.40
codegen_flags: <defaults>
</compile_context>

<pallas_src>
import functools

import numpy as np
import jax
import jax.numpy as jnp
from jax.experimental import pallas as pl
from jax.experimental.pallas import tpu as pltpu

_LANE = 128


def _round_up(n, m):
    return ((n + m - 1) // m) * m


@functools.lru_cache(maxsize=1)
def _chip_info():
    """(usable VMEM budget in bytes, #TensorCores sharing the grid) for this backend."""
    try:
        kind = jax.devices()[0].device_kind.lower()
    except Exception:
        kind = ""
    if ("v5" in kind) or ("v6" in kind):          # v5e / v6e: 1 TC, 128 MiB VMEM
        return 96 * 1024 * 1024, 1
    # v7x (64 MiB VMEM per TC, 2 TCs) and unknown backends: conservative defaults.
    return 56 * 1024 * 1024, 2


# ----------------------------------------------------------------------------- kernels
def _matmul_bias_kernel(x_ref, w_ref, b_ref, o_ref):
    """out = x @ w + b (f32 accumulate)."""
    y = jnp.dot(x_ref[...], w_ref[...], preferred_element_type=jnp.float32)
    o_ref[...] = (y + b_ref[...]).astype(o_ref.dtype)


def _matmul_bias_sigmoid_kernel(x_ref, w_ref, b_ref, sel_ref, o_ref):
    """Fused conv_offset/conv_mask: out = x @ w + b, sigmoid where sel > 0 (mask cols).
    sel is a resident (1, Co_pad) constant -> no per-step iota/compare work."""
    y = jnp.dot(x_ref[...], w_ref[...], preferred_element_type=jnp.float32) + b_ref[...]
    o_ref[...] = jnp.where(sel_ref[...] > 0.0, jax.nn.sigmoid(y), y).astype(o_ref.dtype)


# ----------------------------------------------------------------------------- tiled matmul
def _pick_tm(M, num_tc, vmem_cap, fixed, per_row):
    """Largest row tile that (a) fits the VMEM budget, (b) divides M (no row-pad copies)
    and (c) splits the grid evenly across TensorCores; relax (c), then (b), if needed."""
    preferred = (2048, 1024, 512, 256, 128) if num_tc > 1 else (4096, 2048, 1024, 512, 256, 128)
    budget = int(0.8 * vmem_cap)
    cap_rows = _round_up(max(M, 1), _LANE)
    fits = [t for t in preferred if fixed + t * per_row <= budget and t <= cap_rows]
    if not fits:
        fits = [min(128, cap_rows)]
    for t in fits:
        if M % t == 0 and (M // t) % num_tc == 0:
            return t
    for t in fits:
        if M % t == 0:
            return t
    return fits[0]


def _tiled_matmul(cols, weight, bias, *, sigmoid_cols=None,
                  compute_dtype=jnp.bfloat16, out_dtype=jnp.float32):
    """Row-tiled Pallas matmul: returns (cols @ weight + bias)[:M, :Co] in out_dtype.

    cols: [M, Kd], weight: [Kd, Co], bias: [Co]. Kd and Co are zero-padded to 128-lane
    multiples; rows are padded to the chosen (chip-aware) row tile. If sigmoid_cols is
    (lo, hi), sigmoid is applied in-kernel to output columns [lo, hi)."""
    M, Kd = cols.shape
    Co = weight.shape[1]
    Kd_p = _round_up(Kd, _LANE)
    Co_p = _round_up(Co, _LANE)
    ib = jnp.dtype(compute_dtype).itemsize
    ob = jnp.dtype(out_dtype).itemsize

    vmem_cap, num_tc = _chip_info()
    # VMEM model: double-buffered weight/bias/selector (revisited, but the pipeline still
    # allocates 2 buffers) + per-row double-buffered input and output tiles + in-kernel
    # f32 temporaries of the output tile.
    fixed = 2 * Kd_p * Co_p * ib + 4 * Co_p * 4
    per_row = 2 * Kd_p * ib + 2 * Co_p * ob + 2 * Co_p * 4
    tm = _pick_tm(M, num_tc, vmem_cap, fixed, per_row)
    Mp = _round_up(M, tm)

    cols = jnp.pad(cols.astype(compute_dtype), ((0, Mp - M), (0, Kd_p - Kd)))
    w = jnp.pad(weight.astype(compute_dtype), ((0, Kd_p - Kd), (0, Co_p - Co)))
    b = jnp.pad(bias.astype(jnp.float32), (0, Co_p - Co)).reshape(1, Co_p)

    args = [cols, w, b]
    in_specs = [pl.BlockSpec((tm, Kd_p), lambda i: (i, 0)),
                pl.BlockSpec((Kd_p, Co_p), lambda i: (0, 0)),
                pl.BlockSpec((1, Co_p), lambda i: (0, 0))]
    if sigmoid_cols is None:
        kernel_fn = _matmul_bias_kernel
    else:
        lo, hi = sigmoid_cols
        sel = ((np.arange(Co_p) >= lo) & (np.arange(Co_p) < hi)).astype(np.float32)
        args.append(jnp.asarray(sel).reshape(1, Co_p))
        in_specs.append(pl.BlockSpec((1, Co_p), lambda i: (0, 0)))
        kernel_fn = _matmul_bias_sigmoid_kernel

    need = fixed + tm * per_row
    vmem_limit = int(min(max(2 * need, 16 * 1024 * 1024), vmem_cap))

    out = pl.pallas_call(
        kernel_fn,
        out_shape=jax.ShapeDtypeStruct((Mp, Co_p), out_dtype),
        grid=(Mp // tm,),
        in_specs=in_specs,
        out_specs=pl.BlockSpec((tm, Co_p), lambda i: (i, 0)),
        compiler_params=pltpu.CompilerParams(
            dimension_semantics=("parallel",),
            vmem_limit_bytes=vmem_limit),
    )(*args)
    return out[:M, :Co]


# ----------------------------------------------------------------------------- glue
def _im2col(x_nchw, kH, kW, stride, padding, dilation, dtype):
    """NCHW -> [N*Ho*Wo, C*kH*kW] columns (column index = c*(kH*kW) + i*kW + j).
    Input is cast to `dtype` BEFORE the tap-stack/transpose so the slab-building data
    movement runs at half the bytes."""
    N, C, H, W = x_nchw.shape
    Ho = (H + 2 * padding - dilation * (kH - 1) - 1) // stride + 1
    Wo = (W + 2 * padding - dilation * (kW - 1) - 1) // stride + 1
    xp = jnp.pad(x_nchw.astype(dtype),
                 ((0, 0), (0, 0), (padding, padding), (padding, padding)))
    taps = []
    for i in range(kH):
        for j in range(kW):
            ys, xs = i * dilation, j * dilation
            taps.append(xp[:, :, ys:ys + (Ho - 1) * stride + 1:stride,
                              xs:xs + (Wo - 1) * stride + 1:stride])      # [N,C,Ho,Wo]
    cols = jnp.stack(taps, axis=2)                                        # [N,C,K,Ho,Wo]
    cols = cols.transpose(0, 3, 4, 1, 2).reshape(N * Ho * Wo, C * kH * kW)
    return cols, Ho, Wo


def _modulated_bilinear_gather(x_nchw, py, px, mask, out_dtype):
    """Bilinear-sample x at (py, px) with zeros outside bounds and scale by the DCNv2 mask
    (torchvision DeformConv2d semantics). x: [N,C,H,W]; py/px/mask: [N,K,Ho,Wo].
    Returns [N,C,K,Ho,Wo] in out_dtype (cast before the big transpose that follows).

    TODO(synk): data-dependent per-pixel gather kept in plain JAX (no robust Pallas-TPU
    vector gather for per-element dynamic indices); it is fused by the jitted wrapper."""
    N, C, H, W = x_nchw.shape
    _, K, Ho, Wo = py.shape
    flat = x_nchw.astype(out_dtype).reshape(N, C, H * W)    # gather at compute precision
    y0 = jnp.floor(py)
    x0 = jnp.floor(px)
    ly, lx = py - y0, px - x0
    y0i, x0i = y0.astype(jnp.int32), x0.astype(jnp.int32)
    acc = None
    for dy, wy in ((0, 1.0 - ly), (1, ly)):
        for dx, wx in ((0, 1.0 - lx), (1, lx)):
            yy, xx = y0i + dy, x0i + dx
            valid = (yy >= 0) & (yy < H) & (xx >= 0) & (xx < W)
            lin = jnp.clip(yy, 0, H - 1) * W + jnp.clip(xx, 0, W - 1)     # [N,K,Ho,Wo]
            idx = jnp.broadcast_to(lin.reshape(N, 1, K * Ho * Wo), (N, C, K * Ho * Wo))
            vals = jnp.take_along_axis(flat, idx, axis=2).reshape(N, C, K, Ho, Wo)
            w = (wy * wx * valid.astype(jnp.float32))[:, None]
            term = w * vals.astype(jnp.float32)
            acc = term if acc is None else acc + term
    # modulation mask folded into the gather epilogue (one fused elementwise pass).
    return (acc * mask[:, None]).astype(out_dtype)


# ----------------------------------------------------------------------------- module
def init_dcn_sep_params(key, in_channels, in_channels_features, out_channels, kH, kW,
                        deformable_groups=1):
    ks = jax.random.split(key, 6)
    off_c = deformable_groups * kH * kW
    return {
        "dcn_w": 0.10 * jax.random.normal(ks[0], (out_channels, in_channels, kH, kW), jnp.float32),
        "dcn_b": 0.10 * jax.random.normal(ks[1], (out_channels,), jnp.float32),
        "off_w": 0.10 * jax.random.normal(ks[2], (2 * off_c, in_channels_features, kH, kW), jnp.float32),
        "off_b": 0.05 * jax.random.normal(ks[3], (2 * off_c,), jnp.float32),
        "msk_w": 0.10 * jax.random.normal(ks[4], (off_c, in_channels_features, kH, kW), jnp.float32),
        "msk_b": 0.05 * jax.random.normal(ks[5], (off_c,), jnp.float32),
    }


@functools.partial(
    jax.jit,
    static_argnames=("kernel_size", "stride", "padding", "dilation", "groups",
                     "deformable_groups", "compute_dtype"))
def dcn_sep_forward(x, feat, params, *, kernel_size=3, stride=1, padding=1, dilation=1,
                    groups=1, deformable_groups=1, compute_dtype=jnp.bfloat16):
    """DCN_sep.forward: offset = conv_offset(feat); mask = sigmoid(conv_mask(feat));
    return modulated torchvision DeformConv2d(x, offset, mask). NCHW I/O like PyTorch."""
    # TODO(synk): groups > 1 / deformable_groups > 1 not implemented (module defaults).
    assert groups == 1 and deformable_groups == 1
    kH = kW = kernel_size
    N, Cin, H, W = x.shape
    Cf = feat.shape[1]
    K = kH * kW

    # --- fused conv_offset + conv_mask: one im2col pass, ONE Pallas matmul ----------
    cols_f, Ho, Wo = _im2col(feat, kH, kW, stride, padding, dilation, compute_dtype)
    M = N * Ho * Wo
    w_off = params["off_w"].reshape(2 * K, Cf * K).T
    w_msk = params["msk_w"].reshape(K, Cf * K).T
    w_cat = jnp.concatenate([w_off, w_msk], axis=1)                       # [Cf*K, 3K]
    b_cat = jnp.concatenate([params["off_b"], params["msk_b"]])
    om = _tiled_matmul(cols_f, w_cat, b_cat, sigmoid_cols=(2 * K, 3 * K),
                       compute_dtype=compute_dtype)                       # [M, 3K] f32
    off_flat = om[:, :2 * K]
    msk_flat = om[:, 2 * K:]                                              # [M, K]

    # --- sampling locations (torchvision channel order: (dy, dx) interleaved per tap) --
    off = off_flat.reshape(N, Ho, Wo, K, 2)
    dy = jnp.transpose(off[..., 0], (0, 3, 1, 2))                         # [N,K,Ho,Wo]
    dx = jnp.transpose(off[..., 1], (0, 3, 1, 2))
    mask = jnp.transpose(msk_flat.reshape(N, Ho, Wo, K), (0, 3, 1, 2))    # [N,K,Ho,Wo]
    ky = jnp.repeat(jnp.arange(kH), kW)                                   # tap k = i*kW + j
    kx = jnp.tile(jnp.arange(kW), kH)
    yo = jnp.arange(Ho) * stride - padding
    xo = jnp.arange(Wo) * stride - padding
    base_y = yo[None, None, :, None] + (ky * dilation)[None, :, None, None]
    base_x = xo[None, None, None, :] + (kx * dilation)[None, :, None, None]
    py = base_y.astype(jnp.float32) + dy
    px = base_x.astype(jnp.float32) + dx

    # --- mask-modulated bilinear sampling (mask folded into gather weights) ------------
    sampled = _modulated_bilinear_gather(x, py, px, mask, compute_dtype)  # [N,Cin,K,Ho,Wo]
    cols_d = jnp.transpose(sampled, (0, 3, 4, 1, 2)).reshape(M, Cin * K)  # col = c*K + k

    # --- deformable conv reduction: plain Pallas matmul + bias --------------------------
    Cout = params["dcn_w"].shape[0]
    w_dcn = params["dcn_w"].reshape(Cout, Cin * K).T
    out_flat = _tiled_matmul(cols_d, w_dcn, params["dcn_b"],
                             compute_dtype=compute_dtype)                 # [M, Cout] f32
    return out_flat.reshape(N, Ho, Wo, Cout).transpose(0, 3, 1, 2)        # NCHW


# ----------------------------------------------------------------------------- main
if __name__ == "__main__":
    key = jax.random.PRNGKey(0)
    k_par, k_x, k_f = jax.random.split(key, 3)

    in_channels = 4
    in_channels_features = 4
    out_channels = 4
    kernel_size = 3
    stride, padding, dilation = 1, 1, 1

    params = init_dcn_sep_params(k_par, in_channels, in_channels_features, out_channels,
                                 kernel_size, kernel_size)

    x = jax.random.normal(k_x, (2, in_channels, 16, 16), jnp.float32)
    feat = jax.random.normal(k_f, (2, in_channels_features, 16, 16), jnp.float32)

    out = dcn_sep_forward(x, feat, params, kernel_size=kernel_size,
                          stride=stride, padding=padding, dilation=dilation)
    out = jax.block_until_ready(out)
    assert out.shape == (2, out_channels, 16, 16)
    print("KERNEL_OK")
</pallas_src>

<mosaic_0001>
module attributes {stable_mosaic.version = 11 : i64} {
  func.func @_matmul_bias_sigmoid_kernel(%arg0: i32, %arg1: memref<256x128xbf16, #tpu.memory_space<vmem>>, %arg2: memref<128x128xbf16, #tpu.memory_space<vmem>>, %arg3: memref<1x128xf32, #tpu.memory_space<vmem>>, %arg4: memref<1x128xf32, #tpu.memory_space<vmem>>, %arg5: memref<256x128xf32, #tpu.memory_space<vmem>>) attributes {dimension_semantics = [#tpu.dimension_semantics<parallel>], iteration_bounds = array<i64: 2>, scalar_prefetch = 0 : i64, scratch_operands = 0 : i64, tpu.core_type = #tpu.core_type<tc>, window_params = [{transform_indices = @transform_0, window_bounds = array<i64: 256, 128>}, {pipeline_mode = #tpu.pipeline_mode<synchronous>, transform_indices = @transform_1, window_bounds = array<i64: 128, 128>}, {pipeline_mode = #tpu.pipeline_mode<synchronous>, transform_indices = @transform_2, window_bounds = array<i64: 1, 128>}, {pipeline_mode = #tpu.pipeline_mode<synchronous>, transform_indices = @transform_3, window_bounds = array<i64: 1, 128>}, {transform_indices = @transform_4, window_bounds = array<i64: 256, 128>}]} {
    %c0 = arith.constant 0 : index
    %c0_0 = arith.constant 0 : index
    %0 = vector.load %arg1[%c0, %c0_0] : memref<256x128xbf16, #tpu.memory_space<vmem>>, vector<256x128xbf16>
    %c0_1 = arith.constant 0 : index
    %c0_2 = arith.constant 0 : index
    %1 = vector.load %arg2[%c0_1, %c0_2] : memref<128x128xbf16, #tpu.memory_space<vmem>>, vector<128x128xbf16>
    %cst = arith.constant dense<0.000000e+00> : vector<256x128xf32>
    %2 = tpu.matmul %0, %1, %cst {dimension_numbers = #tpu.dot_dimension_numbers<[1], [0], [0], [1], [0, 0, 1, 1], [], []>} : vector<256x128xbf16>, vector<128x128xbf16>, vector<256x128xf32> -> vector<256x128xf32>
    %c0_3 = arith.constant 0 : index
    %c0_4 = arith.constant 0 : index
    %3 = vector.load %arg3[%c0_3, %c0_4] : memref<1x128xf32, #tpu.memory_space<vmem>>, vector<1x128xf32>
    %4 = vector.broadcast %3 : vector<1x128xf32> to vector<256x128xf32>
    %5 = arith.addf %2, %4 : vector<256x128xf32>
    %c0_5 = arith.constant 0 : index
    %c0_6 = arith.constant 0 : index
    %6 = vector.load %arg4[%c0_5, %c0_6] : memref<1x128xf32, #tpu.memory_space<vmem>>, vector<1x128xf32>
    %cst_7 = arith.constant 0.000000e+00 : f32
    %7 = vector.broadcast %cst_7 : f32 to vector<1x128xf32>
    %8 = arith.cmpf ogt, %6, %7 : vector<1x128xf32>
    %9 = arith.negf %5 : vector<256x128xf32>
    %10 = math.exp %9 : vector<256x128xf32>
    %cst_8 = arith.constant 1.000000e+00 : f32
    %11 = vector.broadcast %cst_8 : f32 to vector<256x128xf32>
    %12 = arith.addf %11, %10 : vector<256x128xf32>
    %13 = arith.divf %11, %12 : vector<256x128xf32>
    %14 = vector.shape_cast %8 : vector<1x128xi1> to vector<1x128xi1>
    %15 = vector.broadcast %14 : vector<1x128xi1> to vector<256x128xi1>
    %16 = arith.select %15, %13, %5 : vector<256x128xi1>, vector<256x128xf32>
    %c0_9 = arith.constant 0 : index
    %c0_10 = arith.constant 0 : index
    %17 = vector.load %arg5[%c0_9, %c0_10] : memref<256x128xf32, #tpu.memory_space<vmem>>, vector<256x128xf32>
    tpu.vector_store %arg5[%c0_9, %c0_10], %16 {strides = array<i32>} : memref<256x128xf32, #tpu.memory_space<vmem>>, vector<256x128xf32>,
    return
  }
  func.func @transform_0(%arg0: i32) -> (i32, i32) {
    %c0_i32 = arith.constant 0 : i32
    %c0_i32_0 = arith.constant 0 : i32
    return %arg0, %c0_i32 : i32, i32
  }
  func.func @transform_1(%arg0: i32) -> (i32, i32) {
    %c0_i32 = arith.constant 0 : i32
    %c0_i32_0 = arith.constant 0 : i32
    %c0_i32_1 = arith.constant 0 : i32
    return %c0_i32, %c0_i32_0 : i32, i32
  }
  func.func @transform_2(%arg0: i32) -> (i32, i32) {
    %c0_i32 = arith.constant 0 : i32
    %c0_i32_0 = arith.constant 0 : i32
    %c0_i32_1 = arith.constant 0 : i32
    return %c0_i32, %c0_i32_0 : i32, i32
  }
  func.func @transform_3(%arg0: i32) -> (i32, i32) {
    %c0_i32 = arith.constant 0 : i32
    %c0_i32_0 = arith.constant 0 : i32
    %c0_i32_1 = arith.constant 0 : i32
    return %c0_i32, %c0_i32_0 : i32, i32
  }
  func.func @transform_4(%arg0: i32) -> (i32, i32) {
    %c0_i32 = arith.constant 0 : i32
    %c0_i32_0 = arith.constant 0 : i32
    return %arg0, %c0_i32 : i32, i32
  }
}

module attributes {stable_mosaic.version = 11 : i64} {
  func.func @_matmul_bias_kernel(%arg0: i32, %arg1: memref<256x128xbf16, #tpu.memory_space<vmem>>, %arg2: memref<128x128xbf16, #tpu.memory_space<vmem>>, %arg3: memref<1x128xf32, #tpu.memory_space<vmem>>, %arg4: memref<256x128xf32, #tpu.memory_space<vmem>>) attributes {dimension_semantics = [#tpu.dimension_semantics<parallel>], iteration_bounds = array<i64: 2>, scalar_prefetch = 0 : i64, scratch_operands = 0 : i64, tpu.core_type = #tpu.core_type<tc>, window_params = [{transform_indices = @transform_0, window_bounds = array<i64: 256, 128>}, {pipeline_mode = #tpu.pipeline_mode<synchronous>, transform_indices = @transform_1, window_bounds = array<i64: 128, 128>}, {pipeline_mode = #tpu.pipeline_mode<synchronous>, transform_indices = @transform_2, window_bounds = array<i64: 1, 128>}, {transform_indices = @transform_3, window_bounds = array<i64: 256, 128>}]} {
    %c0 = arith.constant 0 : index
    %c0_0 = arith.constant 0 : index
    %0 = vector.load %arg1[%c0, %c0_0] : memref<256x128xbf16, #tpu.memory_space<vmem>>, vector<256x128xbf16>
    %c0_1 = arith.constant 0 : index
    %c0_2 = arith.constant 0 : index
    %1 = vector.load %arg2[%c0_1, %c0_2] : memref<128x128xbf16, #tpu.memory_space<vmem>>, vector<128x128xbf16>
    %cst = arith.constant dense<0.000000e+00> : vector<256x128xf32>
    %2 = tpu.matmul %0, %1, %cst {dimension_numbers = #tpu.dot_dimension_numbers<[1], [0], [0], [1], [0, 0, 1, 1], [], []>} : vector<256x128xbf16>, vector<128x128xbf16>, vector<256x128xf32> -> vector<256x128xf32>
    %c0_3 = arith.constant 0 : index
    %c0_4 = arith.constant 0 : index
    %3 = vector.load %arg3[%c0_3, %c0_4] : memref<1x128xf32, #tpu.memory_space<vmem>>, vector<1x128xf32>
    %4 = vector.broadcast %3 : vector<1x128xf32> to vector<256x128xf32>
    %5 = arith.addf %2, %4 : vector<256x128xf32>
    %c0_5 = arith.constant 0 : index
    %c0_6 = arith.constant 0 : index
    %6 = vector.load %arg4[%c0_5, %c0_6] : memref<256x128xf32, #tpu.memory_space<vmem>>, vector<256x128xf32>
    tpu.vector_store %arg4[%c0_5, %c0_6], %5 {strides = array<i32>} : memref<256x128xf32, #tpu.memory_space<vmem>>, vector<256x128xf32>,
    return
  }
  func.func @transform_0(%arg0: i32) -> (i32, i32) {
    %c0_i32 = arith.constant 0 : i32
    %c0_i32_0 = arith.constant 0 : i32
    return %arg0, %c0_i32 : i32, i32
  }
  func.func @transform_1(%arg0: i32) -> (i32, i32) {
    %c0_i32 = arith.constant 0 : i32
    %c0_i32_0 = arith.constant 0 : i32
    %c0_i32_1 = arith.constant 0 : i32
    return %c0_i32, %c0_i32_0 : i32, i32
  }
  func.func @transform_2(%arg0: i32) -> (i32, i32) {
    %c0_i32 = arith.constant 0 : i32
    %c0_i32_0 = arith.constant 0 : i32
    %c0_i32_1 = arith.constant 0 : i32
    return %c0_i32, %c0_i32_0 : i32, i32
  }
  func.func @transform_3(%arg0: i32) -> (i32, i32) {
    %c0_i32 = arith.constant 0 : i32
    %c0_i32_0 = arith.constant 0 : i32
    return %arg0, %c0_i32 : i32, i32
  }
}

</mosaic_0001>

<bundles_post_ra>
// kernel: dcn_sep_forward.2
= control target key start
LH: loop header
LB: loop body
LE: loop exit
PB: predicated region body
PF: predicated region fallthrough
CT: control target
= control target key end

     0   :  { %s1233_s15 = smov 0   ;;  %s1602_s0 = inlined_call_operand.vmem [shape: bf16[512,128], index: 0, kind: input, shape index: {}]   ;;  %s1603_s1 = inlined_call_operand.vmem [shape: bf16[128,128], index: 1, kind: input, shape index: {}]   ;;  %s1604_s2 = inlined_call_operand.vmem [shape: f32[1,128], index: 2, kind: input, shape index: {}]   ;;  %s1605_s3 = inlined_call_operand.vmem [shape: f32[1,128], index: 3, kind: input, shape index: {}]   ;;  %s1606_s4 = inlined_call_operand.vmem [shape: f32[512,128], index: 4, kind: output, shape index: {}]  }
   0x1 LB: > { %s882_s16 = sadd.s32 4294967295, %s1205_s15   ;;  %p886_p0 = scmp.ge.s32.totalorder %s1205_s15, 1  ;;  %s1205_s15 = sphi %s1233_s15, %s14_s15  }
   0x2   : > { %p163_p1 = scmp.lt.s32.totalorder %s1205_s15, 3 }
   0x4   : > { %p164_p2 = pnand %p886_p0, %p163_p1 }
   0x5   : > { %v1047_v0 = vld [vmem:[%s1603_s1] sm:$0xff] (!%p164_p2)   ;;  %s887_s19 = sshll.u32 (!%p164_p2), %s882_s16, 5  ;;  %v1048_v1 = vld [vmem:[%s1603_s1 + $0x8] sm:$0xff] (!%p164_p2)   ;;  %v1049_v2 = vld [vmem:[%s1603_s1 + $0x10] sm:$0xff] (!%p164_p2)   ;;  %v757_v55 = vlaneseq (!%p164_p2) }
   0x6   : > { %167 = sbr.rel (%p164_p2) target bundleno = 339 (0x153), region = 36  ;;  %p190_p3 = scmp.lt.s32.totalorder (!%p164_p2), %s887_s19, 63  ;;  %974 = vmatprep.subr.bf16.mxu0 (!%p164_p2), %v1047_v0  ;;  %1022 = vmatprep.subr.bf16.mxu1 (!%p164_p2), %v1047_v0  ;;  %v1050_v3 = vld [vmem:[%s1603_s1 + $0x18] sm:$0xff] (!%p164_p2)   ;;  %v1051_v6 = vld [vmem:[%s1603_s1 + $0x20] sm:$0xff] (!%p164_p2)   ;;  %v1052_v7 = vld [vmem:[%s1603_s1 + $0x28] sm:$0xff] (!%p164_p2)  }
   0x7   : > { %975 = vmatpush3.bf16.msra.mxu0 (!%p164_p2), %v1047_v0  ;;  %1030 = vmatpush3.bf16.msra.mxu1 (!%p164_p2), %v1047_v0  ;;  %v1053_v8 = vld [vmem:[%s1603_s1 + $0x30] sm:$0xff] (!%p164_p2)   ;;  %v1054_v9 = vld [vmem:[%s1603_s1 + $0x38] sm:$0xff] (!%p164_p2)   ;;  %v1292_v24 = vld [vmem:[%s1604_s2] ss:$0 sm:$0xff] (!%p164_p2) }
   0x8   : > { %976 = vmatprep.subr.bf16.mxu0 (!%p164_p2), %v1048_v1  ;;  %1023 = vmatprep.subr.bf16.mxu1 (!%p164_p2), %v1048_v1 }
   0xb   : > { %977 = vmatpush3.bf16.msra.mxu0 (!%p164_p2), %v1048_v1  ;;  %1031 = vmatpush3.bf16.msra.mxu1 (!%p164_p2), %v1048_v1 }
   0xc   : > { %978 = vmatprep.subr.bf16.mxu0 (!%p164_p2), %v1049_v2  ;;  %1024 = vmatprep.subr.bf16.mxu1 (!%p164_p2), %v1049_v2 }
   0xd   : > { %s1608_s19 = smov (!%p190_p3, %s887_s19), 63 }
   0xe   : > { %s888_s24 = sshll.u32 %s1608_s19, 2  ;;  %s890_s17 = sshll.u32 %s1608_s19, 3 }
   0xf   : > { %s1256_s27 = scalar_lea.vmem %s1602_s0, %s888_s24  ;;  %979 = vmatpush3.bf16.msra.mxu0 %v1049_v2  ;;  %1032 = vmatpush3.bf16.msra.mxu1 %v1049_v2  ;;  %s1387_s20 = scalar_lea.vmem %s1606_s4, %s890_s17 }
  0x10   : > { %v1055_v4 = vld [vmem:[%s1256_s27] sm:$0xff]   ;;  %980 = vmatprep.subr.bf16.mxu0 %v1050_v3  ;;  %1025 = vmatprep.subr.bf16.mxu1 %v1050_v3  ;;  %v1057_v10 = vld [vmem:[%s1256_s27 + $0x8] sm:$0xff]   ;;  %v1059_v12 = vld [vmem:[%s1256_s27 + $0x10] sm:$0xff]  }
  0x11   : > { %v1056_v5 = vld [vmem:[%s1256_s27 + $0x40] sm:$0xff]   ;;  %990 = vmatprep.mubr.bf16.mxu0 %v1055_v4  ;;  %v1058_v11 = vld [vmem:[%s1256_s27 + $0x48] sm:$0xff]   ;;  %v1060_v13 = vld [vmem:[%s1256_s27 + $0x50] sm:$0xff]  }
  0x12   : > { %1006 = vmatprep.mubr.bf16.mxu1 %v1056_v5  ;;  %v1061_v14 = vld [vmem:[%s1256_s27 + $0x18] sm:$0xff]   ;;  %v1063_v16 = vld [vmem:[%s1256_s27 + $0x20] sm:$0xff]   ;;  %v1065_v18 = vld [vmem:[%s1256_s27 + $0x28] sm:$0xff]   ;;  %v758_v5 = vshrl.u32 %v757_v55, 7 }
  0x13   : > { %981 = vmatpush3.bf16.msra.mxu0 %v1050_v3  ;;  %1033 = vmatpush3.bf16.msra.mxu1 %v1050_v3  ;;  %v1062_v15 = vld [vmem:[%s1256_s27 + $0x58] sm:$0xff]   ;;  %v1064_v17 = vld [vmem:[%s1256_s27 + $0x60] sm:$0xff]   ;;  %v1066_v19 = vld [vmem:[%s1256_s27 + $0x68] sm:$0xff]  }
  0x14   : > { %982 = vmatprep.subr.bf16.mxu0 %v1051_v6  ;;  %1026 = vmatprep.subr.bf16.mxu1 %v1051_v6  ;;  %v1067_v20 = vld [vmem:[%s1256_s27 + $0x30] sm:$0xff]   ;;  %v1069_v22 = vld [vmem:[%s1256_s27 + $0x38] sm:$0xff]   ;;  %v562_v3 = vld [vmem:[%s1605_s3] sm:$0x1] }
  0x15   : > { %v1068_v21 = vld [vmem:[%s1256_s27 + $0x70] sm:$0xff]   ;;  %v1070_v23 = vld [vmem:[%s1256_s27 + $0x78] sm:$0xff]   ;;  %vm563_vm0 = vcmp.gt.f32.partialorder %v562_v3, 0.0 }
  0x17   : > { %983 = vmatpush3.bf16.msra.mxu0 %v1051_v6  ;;  %1034 = vmatpush3.bf16.msra.mxu1 %v1051_v6 }
  0x18   : > { %984 = vmatprep.subr.bf16.mxu0 %v1052_v7  ;;  %1027 = vmatprep.subr.bf16.mxu1 %v1052_v7 }
  0x1b   : > { %985 = vmatpush3.bf16.msra.mxu0 %v1052_v7  ;;  %1035 = vmatpush3.bf16.msra.mxu1 %v1052_v7 }
  0x1c   : > { %986 = vmatprep.subr.bf16.mxu0 %v1053_v8  ;;  %1028 = vmatprep.subr.bf16.mxu1 %v1053_v8 }
  0x1f   : > { %987 = vmatpush3.bf16.msra.mxu0 %v1053_v8  ;;  %1036 = vmatpush3.bf16.msra.mxu1 %v1053_v8 }
  0x20   : > { %988 = vmatprep.subr.bf16.mxu0 %v1054_v9  ;;  %1029 = vmatprep.subr.bf16.mxu1 %v1054_v9 }
  0x23   : > { %989 = vmatpush3.bf16.msra.mxu0 %v1054_v9  ;;  %1037 = vmatpush3.bf16.msra.mxu1 %v1054_v9 }
  0x26   : > { %991 = vmatmul.mubr.bf16.vlgmr.msra.gmra.mrb[0].mxu0 %v1057_v10  ;;  %1007 = vmatmul.mubr.bf16.vlgmr.msra.gmra.mrb[0].mxu1 %v1058_v11 }
  0x27   : > { %994 = vmatprep.mubr.bf16.mxu0 %v1059_v12  ;;  %1010 = vmatprep.mubr.bf16.mxu1 %v1060_v13 }
  0x2e   : > { %995 = vmatmul.mubr.bf16.gmra.mrb[4].mxu0 %v1061_v14  ;;  %1011 = vmatmul.mubr.bf16.gmra.mrb[4].mxu1 %v1062_v15 }
  0x2f   : > { %998 = vmatprep.mubr.bf16.mxu0 %v1063_v16  ;;  %1014 = vmatprep.mubr.bf16.mxu1 %v1064_v17  ;;  %v759_v16 = vsub.s32 0, %v758_v5 }
  0x36   : > { %999 = vmatmul.mubr.bf16.gmra.mrb[8].mxu0 %v1065_v18  ;;  %1015 = vmatmul.mubr.bf16.gmra.mrb[8].mxu1 %v1066_v19 }
  0x37   : > { %1002 = vmatprep.mubr.bf16.mxu0 %v1067_v20  ;;  %1018 = vmatprep.mubr.bf16.mxu1 %v1068_v21  ;;  %v1207_v21 = vmov 0  }
  0x3e   : > { %1003 = vmatmul.mubr.bf16.gmra.mrb[12].mxu0 %v1069_v22  ;;  %1019 = vmatmul.mubr.bf16.gmra.mrb[12].mxu1 %v1070_v23  ;;  %v756_v22 = vsel %vm563_vm0, 1, %v1207_v21 }
  0xf9   : > { %v992_v25 = vpop.f32.mrb[0].mxu0  ;;  %v1008_v26 = vpop.f32.mrb[0].mxu1 }
  0xfa   : > { %v1295_v27 = vadd.f32 %v992_v25, %v1292_v24  ;;  %v1298_v28 = vadd.f32 %v1008_v26, %v1292_v24  ;;  %v435_v29 = vpop.f32.mrb[1].mxu0  ;;  %v499_v30 = vpop.f32.mrb[1].mxu1 }
  0xfb   : > { %v1301_v31 = vadd.f32 %v1292_v24, %v435_v29  ;;  %v1304_v32 = vadd.f32 %v1292_v24, %v499_v30  ;;  %v993_v33 = vpop.f32.mrb[2].mxu0  ;;  %v1009_v34 = vpop.f32.mrb[2].mxu1 }
  0xfc   : > { %v918_v35 = vmul.f32 -1.442695, %v1295_v27  ;;  %v934_v36 = vmul.f32 -1.442695, %v1298_v28  ;;  %v1309_v37 = vadd.f32 %v993_v33, %v1292_v24  ;;  %v1312_v38 = vadd.f32 %v1009_v34, %v1292_v24  ;;  %v438_v39 = vpop.f32.mrb[3].mxu0  ;;  %v502_v40 = vpop.f32.mrb[3].mxu1 }
  0xfd   : > { %v916_v41 = vmul.f32 -1.442695, %v1301_v31  ;;  %v932_v42 = vmul.f32 -1.442695, %v1304_v32  ;;  %v1317_v43 = vadd.f32 %v1292_v24, %v438_v39  ;;  %v1320_v44 = vadd.f32 %v1292_v24, %v502_v40 }
  0xfe   : > { %1071 = vpow2.f32 %v918_v35  ;;  %v919_v45 = vmul.f32 -1.442695, %v1309_v37  ;;  %v935_v46 = vmul.f32 -1.442695, %v1312_v38 }
  0xff   : > { %1073 = vpow2.f32 %v934_v36  ;;  %v917_v47 = vmul.f32 -1.442695, %v1317_v43  ;;  %v933_v48 = vmul.f32 -1.442695, %v1320_v44  ;;  %v1360_v36 = vrot.slane %v756_v22, %v759_v16 }
 0x100   : > { %1075 = vpow2.f32 %v916_v41 }
 0x101   : > { %1077 = vpow2.f32 %v932_v42  ;;  %v996_v49 = vpop.f32.mrb[4].mxu0  ;;  %v1012_v50 = vpop.f32.mrb[4].mxu1  ;;  %vm761_vm1 = vcmp.eq.s32.totalorder %v1360_v36, 1 }
 0x102   : > { %1079 = vpow2.f32 %v919_v45  ;;  %v1327_v51 = vadd.f32 %v996_v49, %v1292_v24  ;;  %v1330_v52 = vadd.f32 %v1012_v50, %v1292_v24  ;;  %v451_v53 = vpop.f32.mrb[5].mxu0  ;;  %v515_v54 = vpop.f32.mrb[5].mxu1 }
 0x103   : > { %1081 = vpow2.f32 %v935_v46  ;;  %v1333_v56 = vadd.f32 %v1292_v24, %v451_v53  ;;  %v1336_v57 = vadd.f32 %v1292_v24, %v515_v54  ;;  %v997_v58 = vpop.f32.mrb[6].mxu0  ;;  %v1013_v59 = vpop.f32.mrb[6].mxu1 }
 0x104   : > { %1083 = vpow2.f32 %v917_v47  ;;  %v922_v60 = vmul.f32 -1.442695, %v1327_v51  ;;  %v938_v61 = vmul.f32 -1.442695, %v1330_v52  ;;  %v1341_v62 = vadd.f32 %v997_v58, %v1292_v24  ;;  %v454_v63 = vpop.f32.mrb[7].mxu0  ;;  %v518_v0 = vpop.f32.mrb[7].mxu1 }
 0x105   : > { %1085 = vpow2.f32 %v933_v48  ;;  %v920_v1 = vmul.f32 -1.442695, %v1333_v56  ;;  %v936_v2 = vmul.f32 -1.442695, %v1336_v57  ;;  %v1363_v42 = vadd.f32 %v1013_v59, %v1292_v24 }
 0x106   : > { %1087 = vpow2.f32 %v922_v60  ;;  %v923_v4 = vmul.f32 -1.442695, %v1341_v62  ;;  %v1367_v47 = vadd.f32 %v1292_v24, %v454_v63  ;;  %v1370_v53 = vadd.f32 %v1292_v24, %v518_v0 }
 0x107   : > { %1089 = vpow2.f32 %v938_v61 }
 0x108   : > { %v1072_v6 = vpop.eup %1071  ;;  %1091 = vpow2.f32 %v920_v1 }
 0x109   : > { %v1074_v7 = vpop.eup %1073  ;;  %v662_v8 = vadd.f32 1.0, %v1072_v6  ;;  %1093 = vpow2.f32 %v936_v2  ;;  %v1000_v9 = vpop.f32.mrb[8].mxu0  ;;  %v939_v2 = vmul.f32 -1.442695, %v1363_v42 }
 0x10a   : > { %v1016_v10 = vpop.f32.mrb[8].mxu1  ;;  %v1076_v11 = vpop.eup %1075  ;;  %v678_v12 = vadd.f32 1.0, %v1074_v7  ;;  %1095 = vpow2.f32 %v923_v4  ;;  %v1378_v60 = vadd.f32 %v1000_v9, %v1292_v24 }
 0x10b   : > { %v467_v13 = vpop.f32.mrb[9].mxu0  ;;  %v1349_v14 = vpop.f32.mrb[9].mxu1  ;;  %1097 = vrcp.f32 %v662_v8  ;;  %v660_v17 = vadd.f32 1.0, %v1076_v11  ;;  %v1391_v3 = vadd.f32 %v1016_v10, %v1292_v24  ;;  %v921_v8 = vmul.f32 -1.442695, %v1367_v47 }
 0x10c   : > { %v1078_v15 = vpop.eup %1077  ;;  %v1351_v18 = vpop.f32.mrb[10].mxu0  ;;  %1099 = vrcp.f32 %v678_v12  ;;  %v1399_v9 = vadd.f32 %v1292_v24, %v467_v13  ;;  %v1409_v16 = vadd.f32 %v1292_v24, %v1349_v14 }
 0x10d   : > { %v1353_v19 = vpop.f32.mrb[10].mxu1  ;;  %v1080_v20 = vpop.eup %1079  ;;  %v676_v23 = vadd.f32 1.0, %v1078_v15  ;;  %1101 = vrcp.f32 %v660_v17  ;;  %v937_v15 = vmul.f32 -1.442695, %v1370_v53  ;;  %v942_v22 = vmul.f32 -1.442695, %v1391_v3 }
 0x10e   : > { %v1356_v25 = vpop.f32.mrb[11].mxu0  ;;  %v1082_v26 = vpop.eup %1081  ;;  %v663_v29 = vadd.f32 1.0, %v1080_v20  ;;  %v926_v20 = vmul.f32 -1.442695, %v1378_v60 }
 0x10f   : > { %v1358_v30 = vpop.f32.mrb[11].mxu1  ;;  %v1084_v33 = vpop.eup %1083  ;;  %1103 = vrcp.f32 %v676_v23  ;;  %v679_v34 = vadd.f32 1.0, %v1082_v26  ;;  %v924_v26 = vmul.f32 -1.442695, %v1399_v9 }
 0x110   : > { %v1086_v35 = vpop.eup %1085  ;;  %1105 = vrcp.f32 %v663_v29  ;;  %v661_v39 = vadd.f32 1.0, %v1084_v33  ;;  %v940_v33 = vmul.f32 -1.442695, %v1409_v16 }
 0x111   : > { %v1088_v40 = vpop.eup %1087  ;;  %1107 = vrcp.f32 %v679_v34  ;;  %v677_v41 = vadd.f32 1.0, %v1086_v35  ;;  %v1004_v48 = vpop.f32.mrb[12].mxu0 }
 0x112   : > { %v1090_v45 = vpop.eup %1089  ;;  %1109 = vrcp.f32 %v661_v39  ;;  %v666_v46 = vadd.f32 1.0, %v1088_v40  ;;  %v1372_v54 = vpop.f32.mrb[12].mxu1 }
 0x113   : > { %v1092_v49 = vpop.eup %1091  ;;  %1111 = vrcp.f32 %v677_v41  ;;  %v682_v50 = vadd.f32 1.0, %v1090_v45  ;;  %v1374_v55 = vpop.f32.mrb[13].mxu0 }
 0x114   : > { %v1094_v58 = vpop.eup %1093  ;;  %1113 = vrcp.f32 %v666_v46  ;;  %v664_v59 = vadd.f32 1.0, %v1092_v49  ;;  %v1380_v61 = vpop.f32.mrb[13].mxu1 }
 0x115   : > { %v1382_v63 = vpop.f32.mrb[14].mxu0  ;;  %v1096_v1 = vpop.eup %1095  ;;  %1115 = vrcp.f32 %v682_v50  ;;  %v680_v0 = vadd.f32 1.0, %v1094_v58 }
 0x116   : > { %v1393_v4 = vpop.f32.mrb[14].mxu1  ;;  %v1395_v5 = vpop.f32.mrb[15].mxu0  ;;  %1117 = vrcp.f32 %v664_v59  ;;  %v667_v7 = vadd.f32 1.0, %v1096_v1 }
 0x117   : > { %v1098_v6 = vpop.eup %1097  ;;  %v1401_v11 = vpop.f32.mrb[15].mxu1  ;;  %1119 = vrcp.f32 %v680_v0 }
 0x118   : > { %v1100_v12 = vpop.eup %1099  ;;  %v764_v10 = vsel %vm761_vm1, %v1098_v6, %v1295_v27  ;;  %1121 = vrcp.f32 %v667_v7  ;;  %v1418_v27 = vadd.f32 %v1351_v18, %v1292_v24 }
 0x119   : > { %v1102_v17 = vpop.eup %1101  ;;  %796 = vst [vmem:[%s1387_s20 + $0x10] sm:$0xff] %v764_v10  ;;  %v780_v13 = vsel %vm761_vm1, %v1100_v12, %v1298_v28  ;;  %1123 = vpow2.f32 %v939_v2  ;;  %v1427_v28 = vadd.f32 %v1353_v19, %v1292_v24 }
 0x11a   : > { %v1104_v21 = vpop.eup %1103  ;;  %812 = vst [vmem:[%s1387_s20 + $0x90] sm:$0xff] %v780_v13  ;;  %v762_v14 = vsel %vm761_vm1, %v1102_v17, %v1301_v31  ;;  %1125 = vpow2.f32 %v921_v8  ;;  %v1436_v31 = vadd.f32 %v1292_v24, %v1356_v25  ;;  %v927_v35 = vmul.f32 -1.442695, %v1418_v27 }
 0x11b   : > { %v1106_v23 = vpop.eup %1105  ;;  %794 = vst [vmem:[%s1387_s20] sm:$0xff] %v762_v14  ;;  %v778_v18 = vsel %vm761_vm1, %v1104_v21, %v1304_v32  ;;  %1127 = vpow2.f32 %v937_v15  ;;  %v1445_v32 = vadd.f32 %v1292_v24, %v1358_v30  ;;  %v943_v40 = vmul.f32 -1.442695, %v1427_v28 }
 0x11c   : > { %v1108_v29 = vpop.eup %1107  ;;  %810 = vst [vmem:[%s1387_s20 + $0x80] sm:$0xff] %v778_v18  ;;  %v765_v19 = vsel %vm761_vm1, %v1106_v23, %v1309_v37  ;;  %1129 = vpow2.f32 %v926_v20  ;;  %v1453_v37 = vadd.f32 %v1004_v48, %v1292_v24  ;;  %v925_v46 = vmul.f32 -1.442695, %v1436_v31 }
 0x11d   : > { %v1110_v34 = vpop.eup %1109  ;;  %797 = vst [vmem:[%s1387_s20 + $0x18] sm:$0xff] %v765_v19  ;;  %v781_v25 = vsel %vm761_vm1, %v1108_v29, %v1312_v38  ;;  %1131 = vpow2.f32 %v942_v22  ;;  %v1462_v38 = vadd.f32 %v1372_v54, %v1292_v24  ;;  %v941_v49 = vmul.f32 -1.442695, %v1445_v32 }
 0x11e   : > { %v1112_v39 = vpop.eup %1111  ;;  %813 = vst [vmem:[%s1387_s20 + $0x98] sm:$0xff] %v781_v25  ;;  %v763_v30 = vsel %vm761_vm1, %v1110_v34, %v1317_v43  ;;  %1133 = vpow2.f32 %v924_v26  ;;  %v930_v54 = vmul.f32 -1.442695, %v1453_v37  ;;  %v1495_v18 = vadd.f32 %v1292_v24, %v1374_v55 }
 0x11f   : > { %v1114_v41 = vpop.eup %1113  ;;  %795 = vst [vmem:[%s1387_s20 + $0x8] sm:$0xff] %v763_v30  ;;  %v779_v45 = vsel %vm761_vm1, %v1112_v39, %v1320_v44  ;;  %1135 = vpow2.f32 %v940_v33  ;;  %v946_v59 = vmul.f32 -1.442695, %v1462_v38  ;;  %v1499_v19 = vadd.f32 %v1292_v24, %v1380_v61 }
 0x120   : > { %v1116_v48 = vpop.eup %1115  ;;  %811 = vst [vmem:[%s1387_s20 + $0x88] sm:$0xff] %v779_v45  ;;  %v768_v43 = vsel %vm761_vm1, %v1114_v41, %v1327_v51  ;;  %1137 = vpow2.f32 %v927_v35  ;;  %v1503_v25 = vadd.f32 %v1382_v63, %v1292_v24  ;;  %v1507_v55 = vadd.f32 %v1393_v4, %v1292_v24 }
 0x121   : > { %v1118_v50 = vpop.eup %1117  ;;  %800 = vst [vmem:[%s1387_s20 + $0x30] sm:$0xff] %v768_v43  ;;  %v784_v44 = vsel %vm761_vm1, %v1116_v48, %v1330_v52  ;;  %1139 = vpow2.f32 %v943_v40  ;;  %v928_v61 = vmul.f32 -1.442695, %v1495_v18  ;;  %v1512_v41 = vadd.f32 %v1292_v24, %v1395_v5 }
 0x122   : > { %v1120_v58 = vpop.eup %1119  ;;  %816 = vst [vmem:[%s1387_s20 + $0xb0] sm:$0xff] %v784_v44  ;;  %v766_v51 = vsel %vm761_vm1, %v1118_v50, %v1333_v56  ;;  %1141 = vpow2.f32 %v925_v46  ;;  %v944_v46 = vmul.f32 -1.442695, %v1499_v19  ;;  %v1517_v4 = vadd.f32 %v1292_v24, %v1401_v11 }
 0x123   : > { %v1122_v1 = vpop.eup %1121  ;;  %798 = vst [vmem:[%s1387_s20 + $0x20] sm:$0xff] %v766_v51  ;;  %v782_v0 = vsel %vm761_vm1, %v1120_v58, %v1336_v57  ;;  %1143 = vpow2.f32 %v941_v49  ;;  %v931_v5 = vmul.f32 -1.442695, %v1503_v25  ;;  %v947_v24 = vmul.f32 -1.442695, %v1507_v55 }
 0x124   : > { %v1124_v52 = vpop.eup %1123  ;;  %814 = vst [vmem:[%s1387_s20 + $0xa0] sm:$0xff] %v782_v0  ;;  %v769_v2 = vsel %vm761_vm1, %v1122_v1, %v1341_v62  ;;  %1145 = vpow2.f32 %v930_v54  ;;  %v929_v44 = vmul.f32 -1.442695, %v1512_v41  ;;  %v945_v58 = vmul.f32 -1.442695, %v1517_v4 }
 0x125   : > { %v1126_v6 = vpop.eup %1125  ;;  %801 = vst [vmem:[%s1387_s20 + $0x38] sm:$0xff] %v769_v2  ;;  %v683_v56 = vadd.f32 1.0, %v1124_v52  ;;  %1147 = vpow2.f32 %v946_v59 }
 0x126   : > { %v1128_v7 = vpop.eup %1127  ;;  %v665_v8 = vadd.f32 1.0, %v1126_v6 }
 0x127   : > { %v1130_v12 = vpop.eup %1129  ;;  %1149 = vrcp.f32 %v683_v56  ;;  %v681_v10 = vadd.f32 1.0, %v1128_v7 }
 0x128   : > { %v1132_v15 = vpop.eup %1131  ;;  %1151 = vrcp.f32 %v665_v8  ;;  %v670_v57 = vadd.f32 1.0, %v1130_v12 }
 0x129   : > { %v1134_v17 = vpop.eup %1133  ;;  %1153 = vrcp.f32 %v681_v10  ;;  %v686_v13 = vadd.f32 1.0, %v1132_v15 }
 0x12a   : > { %v1136_v20 = vpop.eup %1135  ;;  %1155 = vrcp.f32 %v670_v57  ;;  %v668_v62 = vadd.f32 1.0, %v1134_v17 }
 0x12b   : > { %v1138_v21 = vpop.eup %1137  ;;  %1157 = vrcp.f32 %v686_v13  ;;  %v684_v14 = vadd.f32 1.0, %v1136_v20 }
 0x12c   : > { %v1140_v22 = vpop.eup %1139  ;;  %1159 = vrcp.f32 %v668_v62  ;;  %v671_v23 = vadd.f32 1.0, %v1138_v21 }
 0x12d   : > { %v1142_v26 = vpop.eup %1141  ;;  %1161 = vrcp.f32 %v684_v14  ;;  %v687_v29 = vadd.f32 1.0, %v1140_v22 }
 0x12e   : > { %v1144_v33 = vpop.eup %1143  ;;  %1163 = vrcp.f32 %v671_v23  ;;  %v669_v34 = vadd.f32 1.0, %v1142_v26 }
 0x12f   : > { %v1146_v35 = vpop.eup %1145  ;;  %1165 = vrcp.f32 %v687_v29  ;;  %v685_v39 = vadd.f32 1.0, %v1144_v33 }
 0x130   : > { %v1148_v30 = vpop.eup %1147  ;;  %1167 = vrcp.f32 %v669_v34  ;;  %v674_v40 = vadd.f32 1.0, %v1146_v35 }
 0x131   : > { %v1150_v63 = vpop.eup %1149  ;;  %1169 = vrcp.f32 %v685_v39  ;;  %v690_v45 = vadd.f32 1.0, %v1148_v30 }
 0x132   : > { %v1152_v48 = vpop.eup %1151  ;;  %v785_v43 = vsel %vm761_vm1, %v1150_v63, %v1363_v42  ;;  %1171 = vrcp.f32 %v674_v40 }
 0x133   : > { %v1154_v49 = vpop.eup %1153  ;;  %817 = vst [vmem:[%s1387_s20 + $0xb8] sm:$0xff] %v785_v43  ;;  %v767_v50 = vsel %vm761_vm1, %v1152_v48, %v1367_v47  ;;  %1173 = vrcp.f32 %v690_v45 }
 0x134   : > { %v1156_v11 = vpop.eup %1155  ;;  %799 = vst [vmem:[%s1387_s20 + $0x28] sm:$0xff] %v767_v50  ;;  %v783_v42 = vsel %vm761_vm1, %v1154_v49, %v1370_v53  ;;  %1175 = vpow2.f32 %v928_v61 }
 0x135   : > { %v1158_v54 = vpop.eup %1157  ;;  %815 = vst [vmem:[%s1387_s20 + $0xa8] sm:$0xff] %v783_v42  ;;  %v772_v47 = vsel %vm761_vm1, %v1156_v11, %v1378_v60  ;;  %1177 = vpow2.f32 %v944_v46 }
 0x136   : > { %v1160_v51 = vpop.eup %1159  ;;  %804 = vst [vmem:[%s1387_s20 + $0x50] sm:$0xff] %v772_v47  ;;  %v788_v53 = vsel %vm761_vm1, %v1158_v54, %v1391_v3  ;;  %1179 = vpow2.f32 %v931_v5 }
 0x137   : > { %v1162_v59 = vpop.eup %1161  ;;  %820 = vst [vmem:[%s1387_s20 + $0xd0] sm:$0xff] %v788_v53  ;;  %v770_v1 = vsel %vm761_vm1, %v1160_v51, %v1399_v9  ;;  %1181 = vpow2.f32 %v947_v24 }
 0x138   : > { %v1164_v60 = vpop.eup %1163  ;;  %802 = vst [vmem:[%s1387_s20 + $0x40] sm:$0xff] %v770_v1  ;;  %v786_v0 = vsel %vm761_vm1, %v1162_v59, %v1409_v16  ;;  %1183 = vpow2.f32 %v929_v44 }
 0x139   : > { %v1166_v52 = vpop.eup %1165  ;;  %818 = vst [vmem:[%s1387_s20 + $0xc0] sm:$0xff] %v786_v0  ;;  %v773_v3 = vsel %vm761_vm1, %v1164_v60, %v1418_v27  ;;  %1185 = vpow2.f32 %v945_v58 }
 0x13a   : > { %v1168_v2 = vpop.eup %1167  ;;  %805 = vst [vmem:[%s1387_s20 + $0x58] sm:$0xff] %v773_v3  ;;  %v789_v9 = vsel %vm761_vm1, %v1166_v52, %v1427_v28 }
 0x13b   : > { %v1170_v6 = vpop.eup %1169  ;;  %821 = vst [vmem:[%s1387_s20 + $0xd8] sm:$0xff] %v789_v9  ;;  %v771_v16 = vsel %vm761_vm1, %v1168_v2, %v1436_v31 }
 0x13c   : > { %v1172_v56 = vpop.eup %1171  ;;  %803 = vst [vmem:[%s1387_s20 + $0x48] sm:$0xff] %v771_v16  ;;  %v787_v27 = vsel %vm761_vm1, %v1170_v6, %v1445_v32 }
 0x13d   : > { %v1174_v7 = vpop.eup %1173  ;;  %819 = vst [vmem:[%s1387_s20 + $0xc8] sm:$0xff] %v787_v27  ;;  %v776_v8 = vsel %vm761_vm1, %v1172_v56, %v1453_v37 }
 0x13e   : > { %v1176_v12 = vpop.eup %1175  ;;  %808 = vst [vmem:[%s1387_s20 + $0x70] sm:$0xff] %v776_v8  ;;  %v792_v28 = vsel %vm761_vm1, %v1174_v7, %v1462_v38 }
 0x13f   : > { %v1178_v10 = vpop.eup %1177  ;;  %824 = vst [vmem:[%s1387_s20 + $0xf0] sm:$0xff] %v792_v28  ;;  %v672_v31 = vadd.f32 1.0, %v1176_v12 }
 0x140   : > { %v1180_v15 = vpop.eup %1179  ;;  %v688_v57 = vadd.f32 1.0, %v1178_v10 }
 0x141   : > { %v1182_v17 = vpop.eup %1181  ;;  %1187 = vrcp.f32 %v672_v31  ;;  %v675_v32 = vadd.f32 1.0, %v1180_v15 }
 0x142   : > { %v1184_v13 = vpop.eup %1183  ;;  %1189 = vrcp.f32 %v688_v57  ;;  %v691_v20 = vadd.f32 1.0, %v1182_v17 }
 0x143   : > { %v1186_v37 = vpop.eup %1185  ;;  %1191 = vrcp.f32 %v675_v32  ;;  %v673_v62 = vadd.f32 1.0, %v1184_v13 }
 0x144   : > { %1193 = vrcp.f32 %v691_v20  ;;  %v689_v21 = vadd.f32 1.0, %v1186_v37 }
 0x145   : > { %1195 = vrcp.f32 %v673_v62 }
 0x146   : > { %1197 = vrcp.f32 %v689_v21 }
 0x14b   : > { %v1188_v38 = vpop.eup %1187 }
 0x14c   : > { %v1190_v14 = vpop.eup %1189  ;;  %v774_v22 = vsel %vm761_vm1, %v1188_v38, %v1495_v18 }
 0x14d   : > { %v1192_v23 = vpop.eup %1191  ;;  %806 = vst [vmem:[%s1387_s20 + $0x60] sm:$0xff] %v774_v22  ;;  %v790_v26 = vsel %vm761_vm1, %v1190_v14, %v1499_v19 }
 0x14e   : > { %v1194_v29 = vpop.eup %1193  ;;  %822 = vst [vmem:[%s1387_s20 + $0xe0] sm:$0xff] %v790_v26  ;;  %v777_v33 = vsel %vm761_vm1, %v1192_v23, %v1503_v25 }
 0x14f   : > { %v1196_v34 = vpop.eup %1195  ;;  %809 = vst [vmem:[%s1387_s20 + $0x78] sm:$0xff] %v777_v33  ;;  %v793_v35 = vsel %vm761_vm1, %v1194_v29, %v1507_v55 }
 0x150   : > { %v1198_v39 = vpop.eup %1197  ;;  %825 = vst [vmem:[%s1387_s20 + $0xf8] sm:$0xff] %v793_v35  ;;  %v775_v18 = vsel %vm761_vm1, %v1196_v34, %v1512_v41 }
 0x151   : > { %807 = vst [vmem:[%s1387_s20 + $0x68] sm:$0xff] %v775_v18  ;;  %v791_v19 = vsel %vm761_vm1, %v1198_v39, %v1517_v4 }
 0x152   : > { %823 = vst [vmem:[%s1387_s20 + $0xe8] sm:$0xff] %v791_v19 }
 0x153 PF: > { %s14_s15 = sadd.s32 1, %s1205_s15  }
 0x154   : > { %p11_p4 = scmp.ge.s32.totalorder %s14_s15, 4  }
 0x156   :  { %13 = sbr.rel (!%p11_p4) target bundleno = 1 (0x1), region = 66 }

// kernel: dcn_sep_forward.3
= control target key start
LH: loop header
LB: loop body
LE: loop exit
PB: predicated region body
PF: predicated region fallthrough
CT: control target
= control target key end

     0   :  { %s807_s12 = smov 0   ;;  %s941_s0 = inlined_call_operand.vmem [shape: bf16[512,128], index: 0, kind: input, shape index: {}]   ;;  %s942_s1 = inlined_call_operand.vmem [shape: bf16[128,128], index: 1, kind: input, shape index: {}]   ;;  %s943_s2 = inlined_call_operand.vmem [shape: f32[1,128], index: 2, kind: input, shape index: {}]   ;;  %s944_s3 = inlined_call_operand.vmem [shape: f32[512,128], index: 3, kind: output, shape index: {}]  }
   0x1 LB: > { %s623_s13 = sadd.s32 4294967295, %s785_s12   ;;  %p627_p0 = scmp.ge.s32.totalorder %s785_s12, 1  ;;  %s785_s12 = sphi %s807_s12, %s13_s12  }
   0x2   : > { %p138_p1 = scmp.lt.s32.totalorder %s785_s12, 3 }
   0x4   : > { %p139_p2 = pnand %p627_p0, %p138_p1 }
   0x5   : > { %v755_v0 = vld [vmem:[%s942_s1] sm:$0xff] (!%p139_p2)   ;;  %s628_s16 = sshll.u32 (!%p139_p2), %s623_s13, 5  ;;  %v756_v1 = vld [vmem:[%s942_s1 + $0x8] sm:$0xff] (!%p139_p2)   ;;  %v757_v2 = vld [vmem:[%s942_s1 + $0x10] sm:$0xff] (!%p139_p2)  }
   0x6   : > { %142 = sbr.rel (%p139_p2) target bundleno = 280 (0x118), region = 32  ;;  %p163_p3 = scmp.lt.s32.totalorder (!%p139_p2), %s628_s16, 63  ;;  %683 = vmatprep.subr.bf16.mxu0 (!%p139_p2), %v755_v0  ;;  %731 = vmatprep.subr.bf16.mxu1 (!%p139_p2), %v755_v0  ;;  %v758_v3 = vld [vmem:[%s942_s1 + $0x18] sm:$0xff] (!%p139_p2)   ;;  %v759_v6 = vld [vmem:[%s942_s1 + $0x20] sm:$0xff] (!%p139_p2)   ;;  %v760_v7 = vld [vmem:[%s942_s1 + $0x28] sm:$0xff] (!%p139_p2)  }
   0x7   : > { %684 = vmatpush3.bf16.msra.mxu0 (!%p139_p2), %v755_v0  ;;  %739 = vmatpush3.bf16.msra.mxu1 (!%p139_p2), %v755_v0  ;;  %v761_v8 = vld [vmem:[%s942_s1 + $0x30] sm:$0xff] (!%p139_p2)   ;;  %v762_v9 = vld [vmem:[%s942_s1 + $0x38] sm:$0xff] (!%p139_p2)   ;;  %v867_v24 = vld [vmem:[%s943_s2] ss:$0 sm:$0xff] (!%p139_p2) }
   0x8   : > { %685 = vmatprep.subr.bf16.mxu0 (!%p139_p2), %v756_v1  ;;  %732 = vmatprep.subr.bf16.mxu1 (!%p139_p2), %v756_v1 }
   0xb   : > { %686 = vmatpush3.bf16.msra.mxu0 (!%p139_p2), %v756_v1  ;;  %740 = vmatpush3.bf16.msra.mxu1 (!%p139_p2), %v756_v1 }
   0xc   : > { %687 = vmatprep.subr.bf16.mxu0 (!%p139_p2), %v757_v2  ;;  %733 = vmatprep.subr.bf16.mxu1 (!%p139_p2), %v757_v2 }
   0xd   : > { %s946_s16 = smov (!%p163_p3, %s628_s16), 63 }
   0xe   : > { %s629_s21 = sshll.u32 %s946_s16, 2  ;;  %s631_s8 = sshll.u32 %s946_s16, 3 }
   0xf   : > { %s830_s24 = scalar_lea.vmem %s941_s0, %s629_s21  ;;  %688 = vmatpush3.bf16.msra.mxu0 %v757_v2  ;;  %741 = vmatpush3.bf16.msra.mxu1 %v757_v2  ;;  %s872_s14 = scalar_lea.vmem %s944_s3, %s631_s8 }
  0x10   : > { %v763_v4 = vld [vmem:[%s830_s24] sm:$0xff]   ;;  %689 = vmatprep.subr.bf16.mxu0 %v758_v3  ;;  %734 = vmatprep.subr.bf16.mxu1 %v758_v3  ;;  %v765_v10 = vld [vmem:[%s830_s24 + $0x8] sm:$0xff]   ;;  %v767_v12 = vld [vmem:[%s830_s24 + $0x10] sm:$0xff]  }
  0x11   : > { %v764_v5 = vld [vmem:[%s830_s24 + $0x40] sm:$0xff]   ;;  %699 = vmatprep.mubr.bf16.mxu0 %v763_v4  ;;  %v766_v11 = vld [vmem:[%s830_s24 + $0x48] sm:$0xff]   ;;  %v768_v13 = vld [vmem:[%s830_s24 + $0x50] sm:$0xff]  }
  0x12   : > { %715 = vmatprep.mubr.bf16.mxu1 %v764_v5  ;;  %v769_v14 = vld [vmem:[%s830_s24 + $0x18] sm:$0xff]   ;;  %v771_v16 = vld [vmem:[%s830_s24 + $0x20] sm:$0xff]   ;;  %v773_v18 = vld [vmem:[%s830_s24 + $0x28] sm:$0xff]  }
  0x13   : > { %690 = vmatpush3.bf16.msra.mxu0 %v758_v3  ;;  %742 = vmatpush3.bf16.msra.mxu1 %v758_v3  ;;  %v770_v15 = vld [vmem:[%s830_s24 + $0x58] sm:$0xff]   ;;  %v772_v17 = vld [vmem:[%s830_s24 + $0x60] sm:$0xff]   ;;  %v774_v19 = vld [vmem:[%s830_s24 + $0x68] sm:$0xff]  }
  0x14   : > { %691 = vmatprep.subr.bf16.mxu0 %v759_v6  ;;  %735 = vmatprep.subr.bf16.mxu1 %v759_v6  ;;  %v775_v20 = vld [vmem:[%s830_s24 + $0x30] sm:$0xff]   ;;  %v777_v22 = vld [vmem:[%s830_s24 + $0x38] sm:$0xff]  }
  0x15   : > { %v776_v21 = vld [vmem:[%s830_s24 + $0x70] sm:$0xff]   ;;  %v778_v23 = vld [vmem:[%s830_s24 + $0x78] sm:$0xff]  }
  0x17   : > { %692 = vmatpush3.bf16.msra.mxu0 %v759_v6  ;;  %743 = vmatpush3.bf16.msra.mxu1 %v759_v6 }
  0x18   : > { %693 = vmatprep.subr.bf16.mxu0 %v760_v7  ;;  %736 = vmatprep.subr.bf16.mxu1 %v760_v7 }
  0x1b   : > { %694 = vmatpush3.bf16.msra.mxu0 %v760_v7  ;;  %744 = vmatpush3.bf16.msra.mxu1 %v760_v7 }
  0x1c   : > { %695 = vmatprep.subr.bf16.mxu0 %v761_v8  ;;  %737 = vmatprep.subr.bf16.mxu1 %v761_v8 }
  0x1f   : > { %696 = vmatpush3.bf16.msra.mxu0 %v761_v8  ;;  %745 = vmatpush3.bf16.msra.mxu1 %v761_v8 }
  0x20   : > { %697 = vmatprep.subr.bf16.mxu0 %v762_v9  ;;  %738 = vmatprep.subr.bf16.mxu1 %v762_v9 }
  0x23   : > { %698 = vmatpush3.bf16.msra.mxu0 %v762_v9  ;;  %746 = vmatpush3.bf16.msra.mxu1 %v762_v9 }
  0x26   : > { %700 = vmatmul.mubr.bf16.vlgmr.msra.gmra.mrb[0].mxu0 %v765_v10  ;;  %716 = vmatmul.mubr.bf16.vlgmr.msra.gmra.mrb[0].mxu1 %v766_v11 }
  0x27   : > { %703 = vmatprep.mubr.bf16.mxu0 %v767_v12  ;;  %719 = vmatprep.mubr.bf16.mxu1 %v768_v13 }
  0x2e   : > { %704 = vmatmul.mubr.bf16.gmra.mrb[4].mxu0 %v769_v14  ;;  %720 = vmatmul.mubr.bf16.gmra.mrb[4].mxu1 %v770_v15 }
  0x2f   : > { %707 = vmatprep.mubr.bf16.mxu0 %v771_v16  ;;  %723 = vmatprep.mubr.bf16.mxu1 %v772_v17 }
  0x36   : > { %708 = vmatmul.mubr.bf16.gmra.mrb[8].mxu0 %v773_v18  ;;  %724 = vmatmul.mubr.bf16.gmra.mrb[8].mxu1 %v774_v19 }
  0x37   : > { %711 = vmatprep.mubr.bf16.mxu0 %v775_v20  ;;  %727 = vmatprep.mubr.bf16.mxu1 %v776_v21 }
  0x3e   : > { %712 = vmatmul.mubr.bf16.gmra.mrb[12].mxu0 %v777_v22  ;;  %728 = vmatmul.mubr.bf16.gmra.mrb[12].mxu1 %v778_v23 }
  0xf9   : > { %v701_v25 = vpop.f32.mrb[0].mxu0  ;;  %v717_v26 = vpop.f32.mrb[0].mxu1 }
  0xfa   : > { %v417_v27 = vadd.f32 %v701_v25, %v867_v24  ;;  %v481_v28 = vadd.f32 %v717_v26, %v867_v24  ;;  %v408_v29 = vpop.f32.mrb[1].mxu0  ;;  %v472_v30 = vpop.f32.mrb[1].mxu1 }
  0xfb   : > { %v409_v31 = vadd.f32 %v867_v24, %v408_v29  ;;  %v473_v32 = vadd.f32 %v867_v24, %v472_v30  ;;  %v702_v33 = vpop.f32.mrb[2].mxu0  ;;  %v718_v34 = vpop.f32.mrb[2].mxu1 }
  0xfc   : > { %537 = vst [vmem:[%s872_s14 + $0x10] sm:$0xff] %v417_v27  ;;  %553 = vst [vmem:[%s872_s14 + $0x90] sm:$0xff] %v481_v28  ;;  %v420_v35 = vadd.f32 %v702_v33, %v867_v24  ;;  %v484_v36 = vadd.f32 %v718_v34, %v867_v24  ;;  %v411_v37 = vpop.f32.mrb[3].mxu0  ;;  %v475_v38 = vpop.f32.mrb[3].mxu1 }
  0xfd   : > { %535 = vst [vmem:[%s872_s14] sm:$0xff] %v409_v31  ;;  %551 = vst [vmem:[%s872_s14 + $0x80] sm:$0xff] %v473_v32  ;;  %v412_v39 = vadd.f32 %v867_v24, %v411_v37  ;;  %v476_v40 = vadd.f32 %v867_v24, %v475_v38 }
  0xfe   : > { %538 = vst [vmem:[%s872_s14 + $0x18] sm:$0xff] %v420_v35  ;;  %554 = vst [vmem:[%s872_s14 + $0x98] sm:$0xff] %v484_v36 }
  0xff   : > { %536 = vst [vmem:[%s872_s14 + $0x8] sm:$0xff] %v412_v39  ;;  %552 = vst [vmem:[%s872_s14 + $0x88] sm:$0xff] %v476_v40 }
 0x101   : > { %v705_v41 = vpop.f32.mrb[4].mxu0  ;;  %v721_v42 = vpop.f32.mrb[4].mxu1 }
 0x102   : > { %v433_v43 = vadd.f32 %v705_v41, %v867_v24  ;;  %v497_v44 = vadd.f32 %v721_v42, %v867_v24  ;;  %v424_v45 = vpop.f32.mrb[5].mxu0  ;;  %v488_v46 = vpop.f32.mrb[5].mxu1 }
 0x103   : > { %v425_v47 = vadd.f32 %v867_v24, %v424_v45  ;;  %v489_v48 = vadd.f32 %v867_v24, %v488_v46  ;;  %v706_v49 = vpop.f32.mrb[6].mxu0  ;;  %v722_v50 = vpop.f32.mrb[6].mxu1 }
 0x104   : > { %541 = vst [vmem:[%s872_s14 + $0x30] sm:$0xff] %v433_v43  ;;  %557 = vst [vmem:[%s872_s14 + $0xb0] sm:$0xff] %v497_v44  ;;  %v436_v51 = vadd.f32 %v706_v49, %v867_v24  ;;  %v500_v52 = vadd.f32 %v722_v50, %v867_v24  ;;  %v427_v53 = vpop.f32.mrb[7].mxu0  ;;  %v491_v54 = vpop.f32.mrb[7].mxu1 }
 0x105   : > { %539 = vst [vmem:[%s872_s14 + $0x20] sm:$0xff] %v425_v47  ;;  %555 = vst [vmem:[%s872_s14 + $0xa0] sm:$0xff] %v489_v48  ;;  %v428_v55 = vadd.f32 %v867_v24, %v427_v53  ;;  %v492_v56 = vadd.f32 %v867_v24, %v491_v54 }
 0x106   : > { %542 = vst [vmem:[%s872_s14 + $0x38] sm:$0xff] %v436_v51  ;;  %558 = vst [vmem:[%s872_s14 + $0xb8] sm:$0xff] %v500_v52 }
 0x107   : > { %540 = vst [vmem:[%s872_s14 + $0x28] sm:$0xff] %v428_v55  ;;  %556 = vst [vmem:[%s872_s14 + $0xa8] sm:$0xff] %v492_v56 }
 0x109   : > { %v709_v57 = vpop.f32.mrb[8].mxu0  ;;  %v725_v58 = vpop.f32.mrb[8].mxu1 }
 0x10a   : > { %v449_v59 = vadd.f32 %v709_v57, %v867_v24  ;;  %v513_v60 = vadd.f32 %v725_v58, %v867_v24  ;;  %v440_v61 = vpop.f32.mrb[9].mxu0  ;;  %v504_v62 = vpop.f32.mrb[9].mxu1 }
 0x10b   : > { %v441_v63 = vadd.f32 %v867_v24, %v440_v61  ;;  %v505_v0 = vadd.f32 %v867_v24, %v504_v62  ;;  %v710_v1 = vpop.f32.mrb[10].mxu0  ;;  %v726_v2 = vpop.f32.mrb[10].mxu1 }
 0x10c   : > { %545 = vst [vmem:[%s872_s14 + $0x50] sm:$0xff] %v449_v59  ;;  %561 = vst [vmem:[%s872_s14 + $0xd0] sm:$0xff] %v513_v60  ;;  %v452_v3 = vadd.f32 %v710_v1, %v867_v24  ;;  %v516_v4 = vadd.f32 %v726_v2, %v867_v24  ;;  %v443_v5 = vpop.f32.mrb[11].mxu0  ;;  %v507_v6 = vpop.f32.mrb[11].mxu1 }
 0x10d   : > { %543 = vst [vmem:[%s872_s14 + $0x40] sm:$0xff] %v441_v63  ;;  %559 = vst [vmem:[%s872_s14 + $0xc0] sm:$0xff] %v505_v0  ;;  %v444_v7 = vadd.f32 %v867_v24, %v443_v5  ;;  %v508_v8 = vadd.f32 %v867_v24, %v507_v6 }
 0x10e   : > { %546 = vst [vmem:[%s872_s14 + $0x58] sm:$0xff] %v452_v3  ;;  %562 = vst [vmem:[%s872_s14 + $0xd8] sm:$0xff] %v516_v4 }
 0x10f   : > { %544 = vst [vmem:[%s872_s14 + $0x48] sm:$0xff] %v444_v7  ;;  %560 = vst [vmem:[%s872_s14 + $0xc8] sm:$0xff] %v508_v8 }
 0x111   : > { %v713_v9 = vpop.f32.mrb[12].mxu0  ;;  %v729_v10 = vpop.f32.mrb[12].mxu1 }
 0x112   : > { %v465_v11 = vadd.f32 %v713_v9, %v867_v24  ;;  %v529_v12 = vadd.f32 %v729_v10, %v867_v24  ;;  %v456_v13 = vpop.f32.mrb[13].mxu0  ;;  %v520_v14 = vpop.f32.mrb[13].mxu1 }
 0x113   : > { %v457_v15 = vadd.f32 %v867_v24, %v456_v13  ;;  %v521_v16 = vadd.f32 %v867_v24, %v520_v14  ;;  %v714_v17 = vpop.f32.mrb[14].mxu0  ;;  %v730_v18 = vpop.f32.mrb[14].mxu1 }
 0x114   : > { %549 = vst [vmem:[%s872_s14 + $0x70] sm:$0xff] %v465_v11  ;;  %565 = vst [vmem:[%s872_s14 + $0xf0] sm:$0xff] %v529_v12  ;;  %v468_v19 = vadd.f32 %v714_v17, %v867_v24  ;;  %v532_v20 = vadd.f32 %v730_v18, %v867_v24  ;;  %v459_v21 = vpop.f32.mrb[15].mxu0  ;;  %v523_v22 = vpop.f32.mrb[15].mxu1 }
 0x115   : > { %547 = vst [vmem:[%s872_s14 + $0x60] sm:$0xff] %v457_v15  ;;  %563 = vst [vmem:[%s872_s14 + $0xe0] sm:$0xff] %v521_v16  ;;  %v460_v23 = vadd.f32 %v867_v24, %v459_v21  ;;  %v524_v25 = vadd.f32 %v867_v24, %v523_v22 }
 0x116   : > { %550 = vst [vmem:[%s872_s14 + $0x78] sm:$0xff] %v468_v19  ;;  %566 = vst [vmem:[%s872_s14 + $0xf8] sm:$0xff] %v532_v20 }
 0x117   : > { %548 = vst [vmem:[%s872_s14 + $0x68] sm:$0xff] %v460_v23  ;;  %564 = vst [vmem:[%s872_s14 + $0xe8] sm:$0xff] %v524_v25 }
 0x118 PF: > { %s13_s12 = sadd.s32 1, %s785_s12  }
 0x119   : > { %p10_p4 = scmp.ge.s32.totalorder %s13_s12, 4  }
 0x11b   :  { %12 = sbr.rel (!%p10_p4) target bundleno = 1 (0x1), region = 62 }

</bundles_post_ra>
